<compile_context>
chip_gen: v5e
topology: v5e:2x2
jax: 0.10.0
libtpu: 0.0.40
codegen_flags: <defaults>
</compile_context>

<pallas_src>
import functools

import jax
import jax.numpy as jnp
from jax.experimental import pallas as pl
from jax.experimental.pallas import tpu as pltpu

IN_SZ = 784
H1 = 120
H2 = 84
OUT_SZ = 10

IN_PAD = 896    # 7 * 128: K of the dominant (first) matmul fully aligned
H1_PAD = 128
H2_PAD = 128
OUT_PAD = 128
_NEG = -1e30    # bias for padded classes -> exp() underflows to 0 in log_softmax


def _round_up(n, m):
    return ((n + m - 1) // m) * m


def mlp_kernel(x_ref, w1_ref, b1_ref, w2_ref, b2_ref, w3_ref, b3_ref, o_ref):
    # Entire forward hot path (3 matmuls + ReLU + log_softmax) runs in-kernel.
    # MXU inputs stay in the compute dtype (f32 or bf16); accumulation, bias,
    # ReLU and log_softmax are done in f32 (safe on v5e: no bf16 VPU/EUP there).
    x = x_ref[...]

    h1 = jnp.dot(x, w1_ref[...], preferred_element_type=jnp.float32) + b1_ref[...]
    h1 = jnp.maximum(h1, 0.0).astype(w2_ref.dtype)

    h2 = jnp.dot(h1, w2_ref[...], preferred_element_type=jnp.float32) + b2_ref[...]
    h2 = jnp.maximum(h2, 0.0).astype(w3_ref.dtype)

    logits = jnp.dot(h2, w3_ref[...], preferred_element_type=jnp.float32) + b3_ref[...]

    # log_softmax over the class axis, numerically stable.  Padded classes have
    # a -1e30 bias: they never win the max and contribute ~0 to the sum.
    m = jnp.max(logits, axis=-1, keepdims=True)
    shifted = logits - m
    lse = jnp.log(jnp.sum(jnp.exp(shifted), axis=-1, keepdims=True))
    o_ref[...] = (shifted - lse).astype(o_ref.dtype)


@functools.partial(jax.jit, static_argnames=("batch_tile", "compute_dtype"))
def mlp_forward(x, w1, b1, w2, b2, w3, b3, batch_tile=512,
                compute_dtype=jnp.float32):
    B = x.shape[0]
    # Clamp the batch tile to the (8-aligned) batch so small batches still work;
    # large batches get 512-row lane-dense tiles and >=2 grid steps for v7x's
    # two TensorCores via dimension_semantics=("parallel",).
    bt = min(batch_tile, _round_up(B, 8))
    bt = _round_up(bt, 8)
    B_pad = _round_up(B, bt)
    grid = (B_pad // bt,)

    cdt = jnp.dtype(compute_dtype)

    # One-time (XLA-side) padding: batch rows with zeros (keeps tail tiles
    # NaN-free), feature dims to multiples of 128.  Weights total <0.5 MiB so
    # the padding cost is negligible; on bf16 compute the x bytes are halved.
    xp = jnp.zeros((B_pad, IN_PAD), cdt).at[:B, :IN_SZ].set(x.astype(cdt))
    w1p = jnp.zeros((IN_PAD, H1_PAD), cdt).at[:IN_SZ, :H1].set(w1.astype(cdt))
    w2p = jnp.zeros((H1_PAD, H2_PAD), cdt).at[:H1, :H2].set(w2.astype(cdt))
    w3p = jnp.zeros((H2_PAD, OUT_PAD), cdt).at[:H2, :OUT_SZ].set(w3.astype(cdt))
    b1p = jnp.zeros((1, H1_PAD), jnp.float32).at[:, :H1].set(b1.astype(jnp.float32))
    b2p = jnp.zeros((1, H2_PAD), jnp.float32).at[:, :H2].set(b2.astype(jnp.float32))
    b3p = jnp.full((1, OUT_PAD), _NEG, jnp.float32).at[:, :OUT_SZ].set(
        b3.astype(jnp.float32))

    # Parameters use constant block indices -> Pallas keeps them resident in
    # VMEM across grid steps instead of re-DMAing them per batch tile.
    def full(shape):
        return pl.BlockSpec(shape, lambda i: (0, 0))

    # VMEM budget: double-buffered x/out tiles + params + f32 activations +
    # slack, clamped to [32 MiB, 64 MiB].  Default batch_tile keeps the
    # footprint well under 32 MiB, which is safe on v5e / v6e / v7x alike.
    x_tile_b = bt * IN_PAD * cdt.itemsize
    out_tile_b = bt * OUT_PAD * 4
    param_b = ((IN_PAD * H1_PAD + H1_PAD * H2_PAD + H2_PAD * OUT_PAD) * cdt.itemsize
               + (H1_PAD + H2_PAD + OUT_PAD) * 4)
    act_b = bt * (H1_PAD + H2_PAD + OUT_PAD) * 4
    vmem_est = 2 * (x_tile_b + out_tile_b) + 2 * param_b + act_b + (4 << 20)
    vmem_limit = int(min(max(vmem_est, 32 << 20), 64 << 20))

    out_pad = pl.pallas_call(
        mlp_kernel,
        out_shape=jax.ShapeDtypeStruct((B_pad, OUT_PAD), jnp.float32),
        grid_spec=pltpu.PrefetchScalarGridSpec(
            num_scalar_prefetch=0,
            grid=grid,
            in_specs=[
                pl.BlockSpec((bt, IN_PAD), lambda i: (i, 0)),
                full((IN_PAD, H1_PAD)),
                full((1, H1_PAD)),
                full((H1_PAD, H2_PAD)),
                full((1, H2_PAD)),
                full((H2_PAD, OUT_PAD)),
                full((1, OUT_PAD)),
            ],
            out_specs=pl.BlockSpec((bt, OUT_PAD), lambda i: (i, 0)),
        ),
        compiler_params=pltpu.CompilerParams(
            dimension_semantics=("parallel",),  # batch tiles shard across v7x's 2 TCs
            vmem_limit_bytes=vmem_limit,
        ),
    )(xp, w1p, b1p, w2p, b2p, w3p, b3p)

    # Drop padded batch rows and padded class lanes.
    return out_pad[:B, :OUT_SZ]


def init_params(key):
    """Deterministic init mimicking PyTorch nn.Linear default (U[-1/sqrt(fan_in), +])."""
    ks = jax.random.split(key, 6)

    def linear(kw, kb, fan_in, fan_out):
        bound = 1.0 / jnp.sqrt(fan_in)
        w = jax.random.uniform(kw, (fan_in, fan_out), jnp.float32, -bound, bound)
        b = jax.random.uniform(kb, (1, fan_out), jnp.float32, -bound, bound)
        return w, b

    w1, b1 = linear(ks[0], ks[1], IN_SZ, H1)
    w2, b2 = linear(ks[2], ks[3], H1, H2)
    w3, b3 = linear(ks[4], ks[5], H2, OUT_SZ)
    return w1, b1, w2, b2, w3, b3


def mlp_ref(x, w1, b1, w2, b2, w3, b3):
    h1 = jax.nn.relu(x @ w1 + b1)
    h2 = jax.nn.relu(h1 @ w2 + b2)
    logits = h2 @ w3 + b3
    return jax.nn.log_softmax(logits, axis=1)


if __name__ == "__main__":
    key = jax.random.PRNGKey(0)
    k_x, k_p = jax.random.split(key)

    B = 64  # small batch; IN_SZ=784 corresponds to flattened 28x28 images
    x = jax.random.normal(k_x, (B, IN_SZ), jnp.float32)
    params = init_params(k_p)

    # f32 path: bit-accurate vs. the pure-JAX reference.
    out = jax.block_until_ready(mlp_forward(x, *params))
    ref = mlp_ref(x, *params)
    assert out.shape == (B, OUT_SZ)
    assert jnp.allclose(out, ref, atol=1e-5, rtol=1e-5)

    # bf16 MXU-input path (halves x HBM traffic on v6e/v7x); elementwise stays f32.
    out_bf16 = jax.block_until_ready(
        mlp_forward(x, *params, compute_dtype=jnp.bfloat16))
    assert out_bf16.shape == (B, OUT_SZ)
    assert jnp.allclose(out_bf16, ref, atol=1e-1, rtol=1e-1)

    print("KERNEL_OK")
</pallas_src>

<mosaic_0001>
module attributes {stable_mosaic.version = 11 : i64} {
  func.func @mlp_kernel(%arg0: i32, %arg1: memref<64x896xf32, #tpu.memory_space<vmem>>, %arg2: memref<896x128xf32, #tpu.memory_space<vmem>>, %arg3: memref<1x128xf32, #tpu.memory_space<vmem>>, %arg4: memref<128x128xf32, #tpu.memory_space<vmem>>, %arg5: memref<1x128xf32, #tpu.memory_space<vmem>>, %arg6: memref<128x128xf32, #tpu.memory_space<vmem>>, %arg7: memref<1x128xf32, #tpu.memory_space<vmem>>, %arg8: memref<64x128xf32, #tpu.memory_space<vmem>>) attributes {dimension_semantics = [#tpu.dimension_semantics<parallel>], iteration_bounds = array<i64: 1>, scalar_prefetch = 0 : i64, scratch_operands = 0 : i64, tpu.core_type = #tpu.core_type<tc>, window_params = [{transform_indices = @transform_0, window_bounds = array<i64: 64, 896>}, {pipeline_mode = #tpu.pipeline_mode<synchronous>, transform_indices = @transform_1, window_bounds = array<i64: 896, 128>}, {pipeline_mode = #tpu.pipeline_mode<synchronous>, transform_indices = @transform_2, window_bounds = array<i64: 1, 128>}, {pipeline_mode = #tpu.pipeline_mode<synchronous>, transform_indices = @transform_3, window_bounds = array<i64: 128, 128>}, {pipeline_mode = #tpu.pipeline_mode<synchronous>, transform_indices = @transform_4, window_bounds = array<i64: 1, 128>}, {pipeline_mode = #tpu.pipeline_mode<synchronous>, transform_indices = @transform_5, window_bounds = array<i64: 128, 128>}, {pipeline_mode = #tpu.pipeline_mode<synchronous>, transform_indices = @transform_6, window_bounds = array<i64: 1, 128>}, {transform_indices = @transform_7, window_bounds = array<i64: 64, 128>}]} {
    %c0 = arith.constant 0 : index
    %c0_0 = arith.constant 0 : index
    %0 = vector.load %arg1[%c0, %c0_0] : memref<64x896xf32, #tpu.memory_space<vmem>>, vector<64x896xf32>
    %c0_1 = arith.constant 0 : index
    %c0_2 = arith.constant 0 : index
    %1 = vector.load %arg2[%c0_1, %c0_2] : memref<896x128xf32, #tpu.memory_space<vmem>>, vector<896x128xf32>
    %cst = arith.constant dense<0.000000e+00> : vector<64x128xf32>
    %2 = tpu.matmul %0, %1, %cst {dimension_numbers = #tpu.dot_dimension_numbers<[1], [0], [0], [1], [0, 0, 1, 1], [], []>} : vector<64x896xf32>, vector<896x128xf32>, vector<64x128xf32> -> vector<64x128xf32>
    %c0_3 = arith.constant 0 : index
    %c0_4 = arith.constant 0 : index
    %3 = vector.load %arg3[%c0_3, %c0_4] : memref<1x128xf32, #tpu.memory_space<vmem>>, vector<1x128xf32>
    %4 = vector.broadcast %3 : vector<1x128xf32> to vector<64x128xf32>
    %5 = arith.addf %2, %4 : vector<64x128xf32>
    %cst_5 = arith.constant 0.000000e+00 : f32
    %6 = vector.broadcast %cst_5 : f32 to vector<64x128xf32>
    %7 = arith.maximumf %5, %6 : vector<64x128xf32>
    %c0_6 = arith.constant 0 : index
    %c0_7 = arith.constant 0 : index
    %8 = vector.load %arg4[%c0_6, %c0_7] : memref<128x128xf32, #tpu.memory_space<vmem>>, vector<128x128xf32>
    %cst_8 = arith.constant dense<0.000000e+00> : vector<64x128xf32>
    %9 = tpu.matmul %7, %8, %cst_8 {dimension_numbers = #tpu.dot_dimension_numbers<[1], [0], [0], [1], [0, 0, 1, 1], [], []>} : vector<64x128xf32>, vector<128x128xf32>, vector<64x128xf32> -> vector<64x128xf32>
    %c0_9 = arith.constant 0 : index
    %c0_10 = arith.constant 0 : index
    %10 = vector.load %arg5[%c0_9, %c0_10] : memref<1x128xf32, #tpu.memory_space<vmem>>, vector<1x128xf32>
    %11 = vector.broadcast %10 : vector<1x128xf32> to vector<64x128xf32>
    %12 = arith.addf %9, %11 : vector<64x128xf32>
    %cst_11 = arith.constant 0.000000e+00 : f32
    %13 = vector.broadcast %cst_11 : f32 to vector<64x128xf32>
    %14 = arith.maximumf %12, %13 : vector<64x128xf32>
    %c0_12 = arith.constant 0 : index
    %c0_13 = arith.constant 0 : index
    %15 = vector.load %arg6[%c0_12, %c0_13] : memref<128x128xf32, #tpu.memory_space<vmem>>, vector<128x128xf32>
    %cst_14 = arith.constant dense<0.000000e+00> : vector<64x128xf32>
    %16 = tpu.matmul %14, %15, %cst_14 {dimension_numbers = #tpu.dot_dimension_numbers<[1], [0], [0], [1], [0, 0, 1, 1], [], []>} : vector<64x128xf32>, vector<128x128xf32>, vector<64x128xf32> -> vector<64x128xf32>
    %c0_15 = arith.constant 0 : index
    %c0_16 = arith.constant 0 : index
    %17 = vector.load %arg7[%c0_15, %c0_16] : memref<1x128xf32, #tpu.memory_space<vmem>>, vector<1x128xf32>
    %18 = vector.broadcast %17 : vector<1x128xf32> to vector<64x128xf32>
    %19 = arith.addf %16, %18 : vector<64x128xf32>
    %cst_17 = arith.constant dense<0xFF800000> : vector<64xf32>
    %20 = vector.multi_reduction <maximumf>, %19, %cst_17 [1] : vector<64x128xf32> to vector<64xf32>
    %21 = vector.shape_cast %20 : vector<64xf32> to vector<64x1xf32>
    %22 = vector.broadcast %21 : vector<64x1xf32> to vector<64x128xf32>
    %23 = arith.subf %19, %22 : vector<64x128xf32>
    %24 = math.exp %23 : vector<64x128xf32>
    %cst_18 = arith.constant dense<0.000000e+00> : vector<64xf32>
    %25 = vector.multi_reduction <add>, %24, %cst_18 [1] : vector<64x128xf32> to vector<64xf32>
    %26 = vector.shape_cast %25 : vector<64xf32> to vector<64x1xf32>
    %27 = math.log %26 : vector<64x1xf32>
    %28 = vector.broadcast %27 : vector<64x1xf32> to vector<64x128xf32>
    %29 = arith.subf %23, %28 : vector<64x128xf32>
    %c0_19 = arith.constant 0 : index
    %c0_20 = arith.constant 0 : index
    %30 = vector.load %arg8[%c0_19, %c0_20] : memref<64x128xf32, #tpu.memory_space<vmem>>, vector<64x128xf32>
    tpu.vector_store %arg8[%c0_19, %c0_20], %29 {strides = array<i32>} : memref<64x128xf32, #tpu.memory_space<vmem>>, vector<64x128xf32>,
    return
  }
  func.func @transform_0(%arg0: i32) -> (i32, i32) {
    %c0_i32 = arith.constant 0 : i32
    %c0_i32_0 = arith.constant 0 : i32
    return %arg0, %c0_i32 : i32, i32
  }
  func.func @transform_1(%arg0: i32) -> (i32, i32) {
    %c0_i32 = arith.constant 0 : i32
    %c0_i32_0 = arith.constant 0 : i32
    %c0_i32_1 = arith.constant 0 : i32
    return %c0_i32, %c0_i32_0 : i32, i32
  }
  func.func @transform_2(%arg0: i32) -> (i32, i32) {
    %c0_i32 = arith.constant 0 : i32
    %c0_i32_0 = arith.constant 0 : i32
    %c0_i32_1 = arith.constant 0 : i32
    return %c0_i32, %c0_i32_0 : i32, i32
  }
  func.func @transform_3(%arg0: i32) -> (i32, i32) {
    %c0_i32 = arith.constant 0 : i32
    %c0_i32_0 = arith.constant 0 : i32
    %c0_i32_1 = arith.constant 0 : i32
    return %c0_i32, %c0_i32_0 : i32, i32
  }
  func.func @transform_4(%arg0: i32) -> (i32, i32) {
    %c0_i32 = arith.constant 0 : i32
    %c0_i32_0 = arith.constant 0 : i32
    %c0_i32_1 = arith.constant 0 : i32
    return %c0_i32, %c0_i32_0 : i32, i32
  }
  func.func @transform_5(%arg0: i32) -> (i32, i32) {
    %c0_i32 = arith.constant 0 : i32
    %c0_i32_0 = arith.constant 0 : i32
    %c0_i32_1 = arith.constant 0 : i32
    return %c0_i32, %c0_i32_0 : i32, i32
  }
  func.func @transform_6(%arg0: i32) -> (i32, i32) {
    %c0_i32 = arith.constant 0 : i32
    %c0_i32_0 = arith.constant 0 : i32
    %c0_i32_1 = arith.constant 0 : i32
    return %c0_i32, %c0_i32_0 : i32, i32
  }
  func.func @transform_7(%arg0: i32) -> (i32, i32) {
    %c0_i32 = arith.constant 0 : i32
    %c0_i32_0 = arith.constant 0 : i32
    return %arg0, %c0_i32 : i32, i32
  }
}

</mosaic_0001>

<bundles_post_ra>
// kernel: mlp_forward.1
= control target key start
LH: loop header
LB: loop body
LE: loop exit
PB: predicated region body
PF: predicated region fallthrough
CT: control target
= control target key end

     0   :  { %s1498_s1 = inlined_call_operand.vmem [shape: f32[896,128], index: 1, kind: input, shape index: {}]   ;;  %s1499_s2 = inlined_call_operand.vmem [shape: f32[1,128], index: 2, kind: input, shape index: {}]   ;;  %s1500_s0 = inlined_call_operand.vmem [shape: f32[64,896], index: 0, kind: input, shape index: {}]   ;;  %s1501_s3 = inlined_call_operand.vmem [shape: f32[128,128], index: 3, kind: input, shape index: {}]   ;;  %s1502_s4 = inlined_call_operand.vmem [shape: f32[1,128], index: 4, kind: input, shape index: {}]   ;;  %s1503_s5 = inlined_call_operand.vmem [shape: f32[128,128], index: 5, kind: input, shape index: {}]   ;;  %s1504_s6 = inlined_call_operand.vmem [shape: f32[1,128], index: 6, kind: input, shape index: {}]   ;;  %s1505_s7 = inlined_call_operand.vmem [shape: f32[64,128], index: 7, kind: output, shape index: {}]  }
   0x1   :  { %v97_v0 = vld [vmem:[%s1498_s1 + $0x78] sm:$0xff]  ;;  %v96_v1 = vld [vmem:[%s1498_s1 + $0x70] sm:$0xff]  ;;  %v95_v2 = vld [vmem:[%s1498_s1 + $0x68] sm:$0xff] }
   0x2   :  { %715 = vmatpush.msra.mxu1 %v97_v0  ;;  %198 = vmatpush.msra.mxu0 %v97_v0  ;;  %v94_v3 = vld [vmem:[%s1498_s1 + $0x60] sm:$0xff]  ;;  %v129_v4 = vld [vmem:[%s1498_s1 + $0x178] sm:$0xff]  ;;  %v128_v5 = vld [vmem:[%s1498_s1 + $0x170] sm:$0xff] }
   0x3   :  { %v93_v6 = vld [vmem:[%s1498_s1 + $0x58] sm:$0xff]  ;;  %280 = vmatpush.msra.mxu2 %v129_v4  ;;  %v127_v8 = vld [vmem:[%s1498_s1 + $0x168] sm:$0xff]  ;;  %v144_v9 = vld [vmem:[%s1498_s1 + $0x1f0] sm:$0xff] }
   0x4   :  { %716 = vmatpush.msra.mxu1 %v96_v1  ;;  %199 = vmatpush.msra.mxu0 %v96_v1  ;;  %v145_v7 = vld [vmem:[%s1498_s1 + $0x1f8] sm:$0xff]  ;;  %v92_v10 = vld [vmem:[%s1498_s1 + $0x50] sm:$0xff]  ;;  %v126_v11 = vld [vmem:[%s1498_s1 + $0x160] sm:$0xff] }
   0x5   :  { %281 = vmatpush.msra.mxu2 %v128_v5  ;;  %321 = vmatpush.msra.mxu3 %v145_v7  ;;  %v143_v12 = vld [vmem:[%s1498_s1 + $0x1e8] sm:$0xff]  ;;  %v125_v14 = vld [vmem:[%s1498_s1 + $0x158] sm:$0xff]  ;;  %v142_v15 = vld [vmem:[%s1498_s1 + $0x1e0] sm:$0xff] }
   0x6   :  { %717 = vmatpush.msra.mxu1 %v95_v2  ;;  %200 = vmatpush.msra.mxu0 %v95_v2  ;;  %v91_v13 = vld [vmem:[%s1498_s1 + $0x48] sm:$0xff]  ;;  %v90_v16 = vld [vmem:[%s1498_s1 + $0x40] sm:$0xff]  ;;  %v124_v17 = vld [vmem:[%s1498_s1 + $0x150] sm:$0xff] }
   0x7   :  { %282 = vmatpush.msra.mxu2 %v127_v8  ;;  %322 = vmatpush.msra.mxu3 %v144_v9  ;;  %v141_v18 = vld [vmem:[%s1498_s1 + $0x1d8] sm:$0xff]  ;;  %v123_v20 = vld [vmem:[%s1498_s1 + $0x148] sm:$0xff]  ;;  %v140_v21 = vld [vmem:[%s1498_s1 + $0x1d0] sm:$0xff] }
   0x8   :  { %718 = vmatpush.msra.mxu1 %v94_v3  ;;  %201 = vmatpush.msra.mxu0 %v94_v3  ;;  %v89_v19 = vld [vmem:[%s1498_s1 + $0x38] sm:$0xff]  ;;  %v88_v22 = vld [vmem:[%s1498_s1 + $0x30] sm:$0xff]  ;;  %v122_v23 = vld [vmem:[%s1498_s1 + $0x140] sm:$0xff] }
   0x9   :  { %283 = vmatpush.msra.mxu2 %v126_v11  ;;  %323 = vmatpush.msra.mxu3 %v143_v12  ;;  %v139_v24 = vld [vmem:[%s1498_s1 + $0x1c8] sm:$0xff]  ;;  %v121_v26 = vld [vmem:[%s1498_s1 + $0x138] sm:$0xff]  ;;  %v138_v27 = vld [vmem:[%s1498_s1 + $0x1c0] sm:$0xff] }
   0xa   :  { %719 = vmatpush.msra.mxu1 %v93_v6  ;;  %202 = vmatpush.msra.mxu0 %v93_v6  ;;  %v87_v25 = vld [vmem:[%s1498_s1 + $0x28] sm:$0xff]  ;;  %v86_v28 = vld [vmem:[%s1498_s1 + $0x20] sm:$0xff]  ;;  %v120_v29 = vld [vmem:[%s1498_s1 + $0x130] sm:$0xff] }
   0xb   :  { %284 = vmatpush.msra.mxu2 %v125_v14  ;;  %324 = vmatpush.msra.mxu3 %v142_v15  ;;  %v137_v30 = vld [vmem:[%s1498_s1 + $0x1b8] sm:$0xff]  ;;  %v119_v32 = vld [vmem:[%s1498_s1 + $0x128] sm:$0xff]  ;;  %v136_v33 = vld [vmem:[%s1498_s1 + $0x1b0] sm:$0xff] }
   0xc   :  { %720 = vmatpush.msra.mxu1 %v92_v10  ;;  %203 = vmatpush.msra.mxu0 %v92_v10  ;;  %v85_v31 = vld [vmem:[%s1498_s1 + $0x18] sm:$0xff]  ;;  %v84_v34 = vld [vmem:[%s1498_s1 + $0x10] sm:$0xff]  ;;  %v118_v35 = vld [vmem:[%s1498_s1 + $0x120] sm:$0xff] }
   0xd   :  { %285 = vmatpush.msra.mxu2 %v124_v17  ;;  %325 = vmatpush.msra.mxu3 %v141_v18  ;;  %v135_v36 = vld [vmem:[%s1498_s1 + $0x1a8] sm:$0xff]  ;;  %v117_v38 = vld [vmem:[%s1498_s1 + $0x118] sm:$0xff]  ;;  %v134_v39 = vld [vmem:[%s1498_s1 + $0x1a0] sm:$0xff] }
   0xe   :  { %721 = vmatpush.msra.mxu1 %v91_v13  ;;  %204 = vmatpush.msra.mxu0 %v91_v13  ;;  %v83_v37 = vld [vmem:[%s1498_s1 + $0x8] sm:$0xff]  ;;  %v82_v40 = vld [vmem:[%s1498_s1] sm:$0xff]  ;;  %v113_v43 = vld [vmem:[%s1498_s1 + $0xf8] sm:$0xff] }
   0xf   :  { %286 = vmatpush.msra.mxu2 %v123_v20  ;;  %326 = vmatpush.msra.mxu3 %v140_v21  ;;  %v54_v41 = vld [vmem:[%s1500_s0 + $0xe0] sm:$0xff]  ;;  %v161_v44 = vld [vmem:[%s1498_s1 + $0x278] sm:$0xff]  ;;  %v116_v45 = vld [vmem:[%s1498_s1 + $0x110] sm:$0xff] }
  0x10   :  { %722 = vmatpush.msra.mxu1 %v90_v16  ;;  %205 = vmatpush.msra.mxu0 %v90_v16  ;;  %v26_v42 = vld [vmem:[%s1500_s0] sm:$0xff]  ;;  %v133_v46 = vld [vmem:[%s1498_s1 + $0x198] sm:$0xff]  ;;  %v112_v47 = vld [vmem:[%s1498_s1 + $0xf0] sm:$0xff] }
  0x11   :  { %287 = vmatpush.msra.mxu2 %v122_v23  ;;  %327 = vmatpush.msra.mxu3 %v139_v24  ;;  %v160_v48 = vld [vmem:[%s1498_s1 + $0x270] sm:$0xff]  ;;  %v115_v49 = vld [vmem:[%s1498_s1 + $0x108] sm:$0xff]  ;;  %v114_v53 = vld [vmem:[%s1498_s1 + $0x100] sm:$0xff] }
  0x12   :  { %723 = vmatpush.msra.mxu1 %v89_v19  ;;  %206 = vmatpush.msra.mxu0 %v89_v19  ;;  %v132_v50 = vld [vmem:[%s1498_s1 + $0x190] sm:$0xff]  ;;  %v111_v51 = vld [vmem:[%s1498_s1 + $0xe8] sm:$0xff]  ;;  %v110_v55 = vld [vmem:[%s1498_s1 + $0xe0] sm:$0xff] }
  0x13   :  { %288 = vmatpush.msra.mxu2 %v121_v26  ;;  %328 = vmatpush.msra.mxu3 %v138_v27  ;;  %v159_v52 = vld [vmem:[%s1498_s1 + $0x268] sm:$0xff]  ;;  %v158_v56 = vld [vmem:[%s1498_s1 + $0x260] sm:$0xff]  ;;  %v61_v57 = vld [vmem:[%s1500_s0 + $0x118] sm:$0xff] }
  0x14   :  { %724 = vmatpush.msra.mxu1 %v88_v22  ;;  %207 = vmatpush.msra.mxu0 %v88_v22  ;;  %v131_v54 = vld [vmem:[%s1498_s1 + $0x188] sm:$0xff]  ;;  %v33_v58 = vld [vmem:[%s1500_s0 + $0x38] sm:$0xff]  ;;  %v28_v61 = vld [vmem:[%s1500_s0 + $0x10] sm:$0xff] }
  0x15   :  { %289 = vmatpush.msra.mxu2 %v120_v29  ;;  %329 = vmatpush.msra.mxu3 %v137_v30  ;;  %v109_v59 = vld [vmem:[%s1498_s1 + $0xd8] sm:$0xff]  ;;  %v130_v62 = vld [vmem:[%s1498_s1 + $0x180] sm:$0xff]  ;;  %v108_v63 = vld [vmem:[%s1498_s1 + $0xd0] sm:$0xff] }
  0x16   :  { %725 = vmatpush.msra.mxu1 %v87_v25  ;;  %208 = vmatpush.msra.mxu0 %v87_v25  ;;  %v157_v60 = vld [vmem:[%s1498_s1 + $0x258] sm:$0xff]  ;;  %v156_v0 = vld [vmem:[%s1498_s1 + $0x250] sm:$0xff]  ;;  %v107_v3 = vld [vmem:[%s1498_s1 + $0xc8] sm:$0xff] }
  0x17   :  { %290 = vmatpush.msra.mxu2 %v119_v32  ;;  %330 = vmatpush.msra.mxu3 %v136_v33  ;;  %v193_v1 = vld [vmem:[%s1498_s1 + $0x378] sm:$0xff]  ;;  %v155_v4 = vld [vmem:[%s1498_s1 + $0x248] sm:$0xff]  ;;  %v192_v5 = vld [vmem:[%s1498_s1 + $0x370] sm:$0xff] }
  0x18   :  { %726 = vmatpush.msra.mxu1 %v86_v28  ;;  %209 = vmatpush.msra.mxu0 %v86_v28  ;;  %v29_v2 = vld [vmem:[%s1500_s0 + $0x18] sm:$0xff]  ;;  %v106_v6 = vld [vmem:[%s1498_s1 + $0xc0] sm:$0xff]  ;;  %v68_v8 = vld [vmem:[%s1500_s0 + $0x150] sm:$0xff] }
  0x19   :  { %291 = vmatpush.msra.mxu2 %v118_v35  ;;  %331 = vmatpush.msra.mxu3 %v135_v36  ;;  %v154_v7 = vld [vmem:[%s1498_s1 + $0x240] sm:$0xff]  ;;  %v40_v9 = vld [vmem:[%s1500_s0 + $0x70] sm:$0xff]  ;;  %v105_v10 = vld [vmem:[%s1498_s1 + $0xb8] sm:$0xff] }
  0x1a   :  { %727 = vmatpush.msra.mxu1 %v85_v31  ;;  %210 = vmatpush.msra.mxu0 %v85_v31  ;;  %v153_v11 = vld [vmem:[%s1498_s1 + $0x238] sm:$0xff]  ;;  %v35_v12 = vld [vmem:[%s1500_s0 + $0x48] sm:$0xff]  ;;  %v104_v13 = vld [vmem:[%s1498_s1 + $0xb0] sm:$0xff] }
  0x1b   :  { %292 = vmatpush.msra.mxu2 %v117_v38  ;;  %332 = vmatpush.msra.mxu3 %v134_v39  ;;  %v152_v14 = vld [vmem:[%s1498_s1 + $0x230] sm:$0xff]  ;;  %v191_v15 = vld [vmem:[%s1498_s1 + $0x368] sm:$0xff]  ;;  %v190_v19 = vld [vmem:[%s1498_s1 + $0x360] sm:$0xff] }
  0x1c   :  { %728 = vmatpush.msra.mxu1 %v84_v34  ;;  %211 = vmatpush.msra.mxu0 %v84_v34  ;;  %v36_v16 = vld [vmem:[%s1500_s0 + $0x50] sm:$0xff]  ;;  %v103_v17 = vld [vmem:[%s1498_s1 + $0xa8] sm:$0xff]  ;;  %v102_v20 = vld [vmem:[%s1498_s1 + $0xa0] sm:$0xff] }
  0x1d   :  { %293 = vmatpush.msra.mxu2 %v116_v45  ;;  %333 = vmatpush.msra.mxu3 %v133_v46  ;;  %v151_v18 = vld [vmem:[%s1498_s1 + $0x228] sm:$0xff]  ;;  %v150_v21 = vld [vmem:[%s1498_s1 + $0x220] sm:$0xff]  ;;  %v101_v24 = vld [vmem:[%s1498_s1 + $0x98] sm:$0xff] }
  0x1e   :  { %729 = vmatpush.msra.mxu1 %v83_v37  ;;  %212 = vmatpush.msra.mxu0 %v83_v37  ;;  %v75_v22 = vld [vmem:[%s1500_s0 + $0x188] sm:$0xff]  ;;  %v149_v25 = vld [vmem:[%s1498_s1 + $0x218] sm:$0xff]  ;;  %v42_v26 = vld [vmem:[%s1500_s0 + $0x80] sm:$0xff] }
  0x1f   :  { %294 = vmatpush.msra.mxu2 %v115_v49  ;;  %334 = vmatpush.msra.mxu3 %v132_v50  ;;  %v47_v23 = vld [vmem:[%s1500_s0 + $0xa8] sm:$0xff]  ;;  %v100_v27 = vld [vmem:[%s1498_s1 + $0x90] sm:$0xff]  ;;  %v189_v29 = vld [vmem:[%s1498_s1 + $0x358] sm:$0xff] }
  0x20   :  { %730 = vmatpush.msra.mxu1 %v82_v40  ;;  %213 = vmatpush.msra.mxu0 %v82_v40  ;;  %v148_v28 = vld [vmem:[%s1498_s1 + $0x210] sm:$0xff]  ;;  %v43_v30 = vld [vmem:[%s1500_s0 + $0x88] sm:$0xff]  ;;  %v98_v34 = vld [vmem:[%s1498_s1 + $0x80] sm:$0xff] }
  0x21   :  { %226 = vmatmul.f32.vlgmr.msra.gmra.mxu1 %v54_v41  ;;  %214 = vmatmul.f32.vlgmr.msra.gmra.mxu0 %v26_v42  ;;  %v99_v31 = vld [vmem:[%s1498_s1 + $0x88] sm:$0xff]  ;;  %v188_v33 = vld [vmem:[%s1498_s1 + $0x350] sm:$0xff]  ;;  %v146_v35 = vld [vmem:[%s1498_s1 + $0x200] sm:$0xff] }
  0x22   :  { %239 = vmatpush.msrb.mxu1 %v113_v43  ;;  %362 = vmatpush.msrb.mxu0 %v161_v44  ;;  %v147_v32 = vld [vmem:[%s1498_s1 + $0x208] sm:$0xff]  ;;  %v30_v37 = vld [vmem:[%s1500_s0 + $0x20] sm:$0xff]  ;;  %v177_v38 = vld [vmem:[%s1498_s1 + $0x2f8] sm:$0xff] }
  0x23   :  { %295 = vmatpush.msra.mxu2 %v114_v53  ;;  %335 = vmatpush.msra.mxu3 %v131_v54  ;;  %v27_v36 = vld [vmem:[%s1500_s0 + $0x8] sm:$0xff]  ;;  %v49_v40 = vld [vmem:[%s1500_s0 + $0xb8] sm:$0xff]  ;;  %v176_v41 = vld [vmem:[%s1498_s1 + $0x2f0] sm:$0xff] }
  0x24   :  { %240 = vmatpush.msrb.mxu1 %v112_v47  ;;  %363 = vmatpush.msrb.mxu0 %v160_v48  ;;  %v187_v39 = vld [vmem:[%s1498_s1 + $0x348] sm:$0xff]  ;;  %v186_v42 = vld [vmem:[%s1498_s1 + $0x340] sm:$0xff]  ;;  %v185_v45 = vld [vmem:[%s1498_s1 + $0x338] sm:$0xff] }
  0x25   :  { %296 = vmatmul.f32.vlgmr.msra.gmra.mxu2 %v28_v61  ;;  %336 = vmatpush.msra.mxu3 %v130_v62  ;;  %v50_v43 = vld [vmem:[%s1500_s0 + $0xc0] sm:$0xff]  ;;  %v175_v44 = vld [vmem:[%s1498_s1 + $0x2e8] sm:$0xff]  ;;  %v184_v47 = vld [vmem:[%s1498_s1 + $0x330] sm:$0xff] }
  0x26   :  { %241 = vmatpush.msrb.mxu1 %v111_v51  ;;  %364 = vmatpush.msrb.mxu0 %v159_v52  ;;  %v174_v46 = vld [vmem:[%s1498_s1 + $0x2e0] sm:$0xff]  ;;  %v37_v49 = vld [vmem:[%s1500_s0 + $0x58] sm:$0xff]  ;;  %v183_v51 = vld [vmem:[%s1498_s1 + $0x328] sm:$0xff] }
  0x27   :  { %444 = vmatpush.msrb.mxu2 %v193_v1  ;;  %337 = vmatmul.f32.vlgmr.msra.gmra.mxu3 %v29_v2  ;;  %v34_v48 = vld [vmem:[%s1500_s0 + $0x40] sm:$0xff]  ;;  %v173_v50 = vld [vmem:[%s1498_s1 + $0x2d8] sm:$0xff]  ;;  %v56_v52 = vld [vmem:[%s1500_s0 + $0xf0] sm:$0xff] }
  0x28   :  { %242 = vmatpush.msrb.mxu1 %v110_v55  ;;  %365 = vmatpush.msrb.mxu0 %v158_v56  ;;  %v172_v53 = vld [vmem:[%s1498_s1 + $0x2d0] sm:$0xff]  ;;  %v182_v54 = vld [vmem:[%s1498_s1 + $0x320] sm:$0xff]  ;;  %v57_v55 = vld [vmem:[%s1500_s0 + $0xf8] sm:$0xff] }
  0x29   :  { %229 = vmatmul.f32.gmra.mxu1 %v61_v57  ;;  %217 = vmatmul.f32.gmra.mxu0 %v33_v58  ;;  %v171_v56 = vld [vmem:[%s1498_s1 + $0x2c8] sm:$0xff]  ;;  %v181_v57 = vld [vmem:[%s1498_s1 + $0x318] sm:$0xff]  ;;  %v170_v58 = vld [vmem:[%s1498_s1 + $0x2c0] sm:$0xff] }
  0x2a   :  { %243 = vmatpush.msrb.mxu1 %v109_v59  ;;  %366 = vmatpush.msrb.mxu0 %v157_v60  ;;  %v41_v59 = vld [vmem:[%s1500_s0 + $0x78] sm:$0xff]  ;;  %v44_v60 = vld [vmem:[%s1500_s0 + $0x90] sm:$0xff]  ;;  %v63_v62 = vld [vmem:[%s1500_s0 + $0x128] sm:$0xff] }
  0x2b   :  { %445 = vmatpush.msrb.mxu2 %v192_v5  ;;  %v169_v61 = vld [vmem:[%s1498_s1 + $0x2b8] sm:$0xff]  ;;  %v64_v1 = vld [vmem:[%s1500_s0 + $0x130] sm:$0xff]  ;;  %v179_v2 = vld [vmem:[%s1498_s1 + $0x308] sm:$0xff] }
  0x2c   :  { %244 = vmatpush.msrb.mxu1 %v108_v63  ;;  %367 = vmatpush.msrb.mxu0 %v156_v0  ;;  %v168_v63 = vld [vmem:[%s1498_s1 + $0x2b0] sm:$0xff] }
  0x2d   :  { %299 = vmatmul.f32.gmra.mxu2 %v35_v12  ;;  %v180_v0 = vld [vmem:[%s1498_s1 + $0x310] sm:$0xff]  ;;  %v163_v12 = vld [vmem:[%s1498_s1 + $0x288] sm:$0xff] }
  0x2e   :  { %245 = vmatpush.msrb.mxu1 %v107_v3  ;;  %368 = vmatpush.msrb.mxu0 %v155_v4  ;;  %v167_v3 = vld [vmem:[%s1498_s1 + $0x2a8] sm:$0xff]  ;;  %v166_v4 = vld [vmem:[%s1498_s1 + $0x2a0] sm:$0xff]  ;;  %v48_v5 = vld [vmem:[%s1500_s0 + $0xb0] sm:$0xff] }
  0x2f   :  { %446 = vmatpush.msrb.mxu2 %v191_v15  ;;  %340 = vmatmul.f32.gmra.mxu3 %v36_v16  ;;  %v58_v15 = vld [vmem:[%s1500_s0 + $0x100] sm:$0xff]  ;;  %v77_v16 = vld [vmem:[%s1500_s0 + $0x198] sm:$0xff] }
  0x30   :  { %246 = vmatpush.msrb.mxu1 %v106_v6  ;;  %369 = vmatpush.msrb.mxu0 %v154_v7  ;;  %v51_v6 = vld [vmem:[%s1500_s0 + $0xc8] sm:$0xff]  ;;  %v165_v7 = vld [vmem:[%s1498_s1 + $0x298] sm:$0xff] }
  0x31   :  { %232 = vmatmul.f32.gmra.mxu1 %v68_v8  ;;  %220 = vmatmul.f32.gmra.mxu0 %v40_v9  ;;  %v70_v8 = vld [vmem:[%s1500_s0 + $0x160] sm:$0xff]  ;;  %v164_v9 = vld [vmem:[%s1498_s1 + $0x290] sm:$0xff] }
  0x32   :  { %247 = vmatpush.msrb.mxu1 %v105_v10  ;;  %370 = vmatpush.msrb.mxu0 %v153_v11  ;;  %v178_v10 = vld [vmem:[%s1498_s1 + $0x300] sm:$0xff]  ;;  %v71_v11 = vld [vmem:[%s1500_s0 + $0x168] sm:$0xff] }
  0x33   :  { %447 = vmatpush.msrb.mxu2 %v190_v19  ;;  %v65_v19 = vld [vmem:[%s1500_s0 + $0x138] sm:$0xff] }
  0x34   :  { %248 = vmatpush.msrb.mxu1 %v104_v13  ;;  %371 = vmatpush.msrb.mxu0 %v152_v14  ;;  %v162_v13 = vld [vmem:[%s1498_s1 + $0x280] sm:$0xff]  ;;  %v55_v14 = vld [vmem:[%s1500_s0 + $0xe8] sm:$0xff] }
  0x35   :  { %302 = vmatmul.f32.gmra.mxu2 %v42_v26  ;;  %v46_v26 = vld [vmem:[%s1500_s0 + $0xa0] sm:$0xff] }
  0x36   :  { %249 = vmatpush.msrb.mxu1 %v103_v17  ;;  %372 = vmatpush.msrb.mxu0 %v151_v18  ;;  %v78_v17 = vld [vmem:[%s1500_s0 + $0x1a0] sm:$0xff] }
  0x37   :  { %448 = vmatpush.msrb.mxu2 %v189_v29  ;;  %343 = vmatmul.f32.gmra.mxu3 %v43_v30  ;;  %v62_v18 = vld [vmem:[%s1500_s0 + $0x120] sm:$0xff]  ;;  %v60_v30 = vld [vmem:[%s1500_s0 + $0x110] sm:$0xff] }
  0x38   :  { %250 = vmatpush.msrb.mxu1 %v102_v20  ;;  %373 = vmatpush.msrb.mxu0 %v150_v21  ;;  %v32_v20 = vld [vmem:[%s1500_s0 + $0x30] sm:$0xff]  ;;  %v69_v21 = vld [vmem:[%s1500_s0 + $0x158] sm:$0xff]  ;;  %v38_v29 = vld [vmem:[%s1500_s0 + $0x60] sm:$0xff] }
  0x39   :  { %235 = vmatmul.f32.gmra.mxu1 %v75_v22  ;;  %223 = vmatmul.f32.gmra.mxu0 %v47_v23  ;;  %v72_v22 = vld [vmem:[%s1500_s0 + $0x170] sm:$0xff]  ;;  %v39_v23 = vld [vmem:[%s1500_s0 + $0x68] sm:$0xff] }
  0x3a   :  { %251 = vmatpush.msrb.mxu1 %v101_v24  ;;  %374 = vmatpush.msrb.mxu0 %v149_v25  ;;  %v76_v24 = vld [vmem:[%s1500_s0 + $0x190] sm:$0xff]  ;;  %v79_v25 = vld [vmem:[%s1500_s0 + $0x1a8] sm:$0xff] }
  0x3b   :  { %449 = vmatpush.msrb.mxu2 %v188_v33  ;;  %v52_v33 = vld [vmem:[%s1500_s0 + $0xd0] sm:$0xff] }
  0x3c   :  { %252 = vmatpush.msrb.mxu1 %v100_v27  ;;  %375 = vmatpush.msrb.mxu0 %v148_v28  ;;  %v31_v27 = vld [vmem:[%s1500_s0 + $0x28] sm:$0xff]  ;;  %v53_v28 = vld [vmem:[%s1500_s0 + $0xd8] sm:$0xff] }
  0x3d   :  { %450 = vmatpush.msrb.mxu2 %v187_v39 }
  0x3e   :  { %253 = vmatpush.msrb.mxu1 %v99_v31  ;;  %376 = vmatpush.msrb.mxu0 %v147_v32  ;;  %v45_v31 = vld [vmem:[%s1500_s0 + $0x98] sm:$0xff]  ;;  %v67_v32 = vld [vmem:[%s1500_s0 + $0x148] sm:$0xff] }
  0x3f   :  { %305 = vmatmul.f32.gmra.mxu2 %v49_v40  ;;  %346 = vmatmul.f32.gmra.mxu3 %v50_v43  ;;  %v66_v40 = vld [vmem:[%s1500_s0 + $0x140] sm:$0xff] }
  0x40   :  { %254 = vmatpush.msrb.mxu1 %v98_v34  ;;  %377 = vmatpush.msrb.mxu0 %v146_v35  ;;  %v74_v34 = vld [vmem:[%s1500_s0 + $0x180] sm:$0xff] }
  0x41   :  { %255 = vmatmul.f32.vlgmr.msrb.gmra.mxu1 %v27_v36  ;;  %378 = vmatmul.f32.vlgmr.msrb.gmra.mxu0 %v30_v37  ;;  %v59_v36 = vld [vmem:[%s1500_s0 + $0x108] sm:$0xff]  ;;  %v81_v37 = vld [vmem:[%s1500_s0 + $0x1b8] sm:$0xff] }
  0x42   :  { %403 = vmatpush.msra.mxu1 %v177_v38  ;;  %451 = vmatpush.msrb.mxu2 %v186_v42  ;;  %v508_v38 = vld [vmem:[%s1501_s3 + $0x78] sm:$0xff]  ;;  %v506_v42 = vld [vmem:[%s1501_s3 + $0x68] sm:$0xff] }
  0x43   :  { %513 = vmatpush.msrb.mxu3 %v508_v38 }
  0x44   :  { %404 = vmatpush.msra.mxu1 %v176_v41  ;;  %452 = vmatpush.msrb.mxu2 %v185_v45  ;;  %v507_v41 = vld [vmem:[%s1501_s3 + $0x70] sm:$0xff] }
  0x45   :  { %514 = vmatpush.msrb.mxu3 %v507_v41 }
  0x46   :  { %405 = vmatpush.msra.mxu1 %v175_v44  ;;  %453 = vmatpush.msrb.mxu2 %v184_v47  ;;  %v73_v44 = vld [vmem:[%s1500_s0 + $0x178] sm:$0xff] }
  0x47   :  { %308 = vmatmul.f32.gmra.mxu2 %v56_v52  ;;  %349 = vmatmul.f32.gmra.mxu3 %v57_v55  ;;  %v504_v47 = vld [vmem:[%s1501_s3 + $0x58] sm:$0xff]  ;;  %v502_v52 = vld [vmem:[%s1501_s3 + $0x48] sm:$0xff]  ;;  %v501_v55 = vld [vmem:[%s1501_s3 + $0x40] sm:$0xff] }
  0x48   :  { %406 = vmatpush.msra.mxu1 %v174_v46  ;;  %454 = vmatpush.msrb.mxu2 %v183_v51  ;;  %v505_v46 = vld [vmem:[%s1501_s3 + $0x60] sm:$0xff]  ;;  %v503_v51 = vld [vmem:[%s1501_s3 + $0x50] sm:$0xff] }
  0x49   :  { %258 = vmatmul.f32.gmra.mxu1 %v34_v48  ;;  %381 = vmatmul.f32.gmra.mxu0 %v37_v49  ;;  %v80_v49 = vld [vmem:[%s1500_s0 + $0x1b0] sm:$0xff] }
  0x4a   :  { %407 = vmatpush.msra.mxu1 %v173_v50  ;;  %455 = vmatpush.msrb.mxu2 %v182_v54 }
  0x4b   :  { %515 = vmatpush.msrb.mxu3 %v506_v42 }
  0x4c   :  { %408 = vmatpush.msra.mxu1 %v172_v53  ;;  %456 = vmatpush.msrb.mxu2 %v181_v57  ;;  %v500_v57 = vld [vmem:[%s1501_s3 + $0x38] sm:$0xff] }
  0x4d   :  { %516 = vmatpush.msrb.mxu3 %v505_v46 }
  0x4e   :  { %409 = vmatpush.msra.mxu1 %v171_v56  ;;  %457 = vmatpush.msrb.mxu2 %v180_v0 }
  0x4f   :  { %311 = vmatmul.f32.gmra.mxu2 %v63_v62  ;;  %352 = vmatmul.f32.gmra.mxu3 %v64_v1  ;;  %v497_v1 = vld [vmem:[%s1501_s3 + $0x20] sm:$0xff] }
  0x50   :  { %410 = vmatpush.msra.mxu1 %v170_v58  ;;  %458 = vmatpush.msrb.mxu2 %v179_v2  ;;  %v496_v2 = vld [vmem:[%s1501_s3 + $0x18] sm:$0xff] }
  0x51   :  { %261 = vmatmul.f32.gmra.mxu1 %v41_v59  ;;  %384 = vmatmul.f32.gmra.mxu0 %v44_v60  ;;  %v499_v60 = vld [vmem:[%s1501_s3 + $0x30] sm:$0xff] }
  0x52   :  { %411 = vmatpush.msra.mxu1 %v169_v61  ;;  %459 = vmatpush.msrb.mxu2 %v178_v10  ;;  %v498_v61 = vld [vmem:[%s1501_s3 + $0x28] sm:$0xff] }
  0x53   :  { %517 = vmatpush.msrb.mxu3 %v504_v47 }
  0x54   :  { %412 = vmatpush.msra.mxu1 %v168_v63 }
  0x55   :  { %518 = vmatpush.msrb.mxu3 %v503_v51 }
  0x56   :  { %413 = vmatpush.msra.mxu1 %v167_v3 }
  0x57   :  { %314 = vmatmul.f32.gmra.mxu2 %v70_v8  ;;  %355 = vmatmul.f32.gmra.mxu3 %v71_v11  ;;  %v493_v11 = vld [vmem:[%s1501_s3] sm:$0xff] }
  0x58   :  { %414 = vmatpush.msra.mxu1 %v166_v4  ;;  %519 = vmatpush.msrb.mxu3 %v502_v52 }
  0x59   :  { %264 = vmatmul.f32.gmra.mxu1 %v48_v5  ;;  %387 = vmatmul.f32.gmra.mxu0 %v51_v6  ;;  %v495_v6 = vld [vmem:[%s1501_s3 + $0x10] sm:$0xff] }
  0x5a   :  { %415 = vmatpush.msra.mxu1 %v165_v7  ;;  %520 = vmatpush.msrb.mxu3 %v501_v55  ;;  %v494_v7 = vld [vmem:[%s1501_s3 + $0x8] sm:$0xff] }
  0x5c   :  { %416 = vmatpush.msra.mxu1 %v164_v9  ;;  %521 = vmatpush.msrb.mxu3 %v500_v57 }
  0x5e   :  { %417 = vmatpush.msra.mxu1 %v163_v12  ;;  %522 = vmatpush.msrb.mxu3 %v499_v60 }
  0x5f   :  { %317 = vmatmul.f32.gmra.mxu2 %v77_v16  ;;  %358 = vmatmul.f32.gmra.mxu3 %v78_v17 }
  0x60   :  { %418 = vmatpush.msra.mxu1 %v162_v13  ;;  %523 = vmatpush.msrb.mxu3 %v498_v61 }
  0x61   :  { %267 = vmatmul.f32.gmra.mxu1 %v55_v14  ;;  %390 = vmatmul.f32.gmra.mxu0 %v58_v15  ;;  %v1395_v15 = vld [vmem:[%s1499_s2] ss:$0 sm:$0xff] }
  0x62   :  { %524 = vmatpush.msrb.mxu3 %v497_v1 }
  0x64   :  { %525 = vmatpush.msrb.mxu3 %v496_v2 }
  0x66   :  { %526 = vmatpush.msrb.mxu3 %v495_v6 }
  0x67   :  { %460 = vmatmul.f32.vlgmr.msrb.gmra.mxu2 %v32_v20 }
  0x68   :  { %527 = vmatpush.msrb.mxu3 %v494_v7 }
  0x69   :  { %270 = vmatmul.f32.gmra.mxu1 %v62_v18  ;;  %393 = vmatmul.f32.gmra.mxu0 %v65_v19 }
  0x6a   :  { %528 = vmatpush.msrb.mxu3 %v493_v11 }
  0x6f   :  { %463 = vmatmul.f32.gmra.mxu2 %v39_v23 }
  0x71   :  { %273 = vmatmul.f32.gmra.mxu1 %v69_v21  ;;  %396 = vmatmul.f32.gmra.mxu0 %v72_v22 }
  0x77   :  { %466 = vmatmul.f32.gmra.mxu2 %v46_v26 }
  0x79   :  { %276 = vmatmul.f32.gmra.mxu1 %v76_v24  ;;  %399 = vmatmul.f32.gmra.mxu0 %v79_v25 }
  0x7f   :  { %469 = vmatmul.f32.gmra.mxu2 %v53_v28 }
  0x81   :  { %419 = vmatmul.f32.vlgmr.msra.gmra.mxu1 %v31_v27 }
  0x87   :  { %472 = vmatmul.f32.gmra.mxu2 %v60_v30 }
  0x89   :  { %422 = vmatmul.f32.gmra.mxu1 %v38_v29 }
  0x8f   :  { %475 = vmatmul.f32.gmra.mxu2 %v67_v32 }
  0x91   :  { %425 = vmatmul.f32.gmra.mxu1 %v45_v31 }
  0x97   :  { %478 = vmatmul.f32.gmra.mxu2 %v74_v34 }
  0x99   :  { %428 = vmatmul.f32.gmra.mxu1 %v52_v33 }
  0x9e   :  { %v1311_v35 = vpop.f32.mrf.mxu1  ;;  %v215_v56 = vpop.f32.mrf.mxu0 }
  0x9f   :  { %481 = vmatmul.f32.gmra.mxu2 %v81_v37  ;;  %v216_v17 = vadd.f32 %v1395_v15, %v215_v56 }
  0xa1   :  { %431 = vmatmul.f32.gmra.mxu1 %v59_v36 }
  0xa6   :  { %v1322_v39 = vpop.f32.mrf.mxu1  ;;  %v218_v62 = vpop.f32.mrf.mxu0 }
  0xa7   :  { %v219_v22 = vadd.f32 %v1395_v15, %v218_v62  ;;  %v228_v62 = vadd.f32 %v1395_v15, %v1311_v35 }
  0xa8   :  { %v297_v45 = vpop.f32.mrf.mxu2 }
  0xa9   :  { %434 = vmatmul.f32.gmra.mxu1 %v66_v40 }
  0xaa   :  { %v338_v14 = vpop.f32.mrf.mxu3 }
  0xae   :  { %v1333_v43 = vpop.f32.mrf.mxu1  ;;  %v221_v5 = vpop.f32.mrf.mxu0 }
  0xaf   :  { %v222_v30 = vadd.f32 %v1395_v15, %v221_v5 }
  0xb0   :  { %v300_v50 = vpop.f32.mrf.mxu2 }
  0xb1   :  { %437 = vmatmul.f32.gmra.mxu1 %v73_v44 }
  0xb2   :  { %v341_v21 = vpop.f32.mrf.mxu3 }
  0xb6   :  { %v1344_v48 = vpop.f32.mrf.mxu1  ;;  %v224_v10 = vpop.f32.mrf.mxu0 }
  0xb7   :  { %v225_v44 = vadd.f32 %v1395_v15, %v224_v10 }
  0xb8   :  { %v303_v54 = vpop.f32.mrf.mxu2 }
  0xb9   :  { %440 = vmatmul.f32.gmra.mxu1 %v80_v49 }
  0xba   :  { %v344_v29 = vpop.f32.mrf.mxu3 }
  0xbe   :  { %v256_v53 = vpop.f32.mrf.mxu1  ;;  %v379_v16 = vpop.f32.mrf.mxu0 }
  0xbf   :  { %v257_v20 = vadd.f32 %v256_v53, %v216_v17 }
  0xc1   :  { %v298_v23 = vadd.f32 %v297_v45, %v257_v20 }
  0xc2   :  { %v1361_v59 = vpop.f32.mrf.mxu2  ;;  %v347_v47 = vpop.f32.mrf.mxu3 }
  0xc3   :  { %v339_v26 = vadd.f32 %v338_v14, %v298_v23  ;;  %v576_v23 = vld [vmem:[%s1503_s5 + $0x70] sm:$0xff] }
  0xc5   :  { %v380_v31 = vadd.f32 %v379_v16, %v339_v26 }
  0xc6   :  { %v259_v58 = vpop.f32.mrf.mxu1  ;;  %v382_v24 = vpop.f32.mrf.mxu0 }
  0xc7   :  { %v260_v27 = vadd.f32 %v259_v58, %v219_v22 }
  0xc9   :  { %v301_v32 = vadd.f32 %v300_v50, %v260_v27 }
  0xca   :  { %v1369_v0 = vpop.f32.mrf.mxu2 }
  0xcb   :  { %v342_v37 = vadd.f32 %v341_v21, %v301_v32 }
  0xcd   :  { %v383_v45 = vadd.f32 %v382_v24, %v342_v37 }
  0xce   :  { %v262_v63 = vpop.f32.mrf.mxu1  ;;  %v385_v36 = vpop.f32.mrf.mxu0 }
  0xcf   :  { %v263_v38 = vadd.f32 %v262_v63, %v222_v30  ;;  %v574_v30 = vld [vmem:[%s1503_s5 + $0x60] sm:$0xff] }
  0xd1   :  { %v304_v46 = vadd.f32 %v303_v54, %v263_v38  ;;  %v350_v54 = vpop.f32.mrf.mxu3  ;;  %v237_v38 = vadd.f32 %v1395_v15, %v1344_v48  ;;  %v569_v48 = vld [vmem:[%s1503_s5 + $0x38] sm:$0xff] }
  0xd2   :  { %v1377_v4 = vpop.f32.mrf.mxu2 }
  0xd3   :  { %v345_v52 = vadd.f32 %v344_v29, %v304_v46  ;;  %v570_v46 = vld [vmem:[%s1503_s5 + $0x40] sm:$0xff] }
  0xd5   :  { %v386_v57 = vadd.f32 %v385_v36, %v345_v52 }
  0xd6   :  { %v265_v3 = vpop.f32.mrf.mxu1  ;;  %v388_v50 = vpop.f32.mrf.mxu0 }
  0xd7   :  { %v266_v53 = vadd.f32 %v265_v3, %v225_v44 }
  0xd9   :  { %v307_v58 = vadd.f32 %v1361_v59, %v266_v53  ;;  %v231_v59 = vadd.f32 %v1395_v15, %v1322_v39  ;;  %v353_v20 = vpop.f32.mrf.mxu3 }
  0xda   :  { %v1385_v9 = vpop.f32.mrf.mxu2 }
  0xdb   :  { %v348_v1 = vadd.f32 %v347_v47, %v307_v58 }
  0xdd   :  { %v389_v3 = vadd.f32 %v388_v50, %v348_v1  ;;  %v567_v50 = vld [vmem:[%s1503_s5 + $0x28] sm:$0xff] }
  0xde   :  { %v268_v8 = vpop.f32.mrf.mxu1  ;;  %v391_v7 = vpop.f32.mrf.mxu0 }
  0xdf   :  { %v269_v2 = vadd.f32 %v268_v8, %v228_v62 }
  0xe1   :  { %v310_v10 = vadd.f32 %v1369_v0, %v269_v2  ;;  %v577_v0 = vld [vmem:[%s1503_s5 + $0x78] sm:$0xff] }
  0xe2   :  { %v1390_v13 = vpop.f32.mrf.mxu2  ;;  %582 = vmatpush.msra.mxu0 %v577_v0  ;;  %731 = vmatpush.msra.mxu2 %v577_v0 }
  0xe3   :  { %v351_v17 = vadd.f32 %v350_v54, %v310_v10  ;;  %v748_v10 = vld [vmem:[%s1502_s4] ss:$0 sm:$0xff] }
  0xe4   :  { %583 = vmatpush.msra.mxu0 %v576_v23  ;;  %732 = vmatpush.msra.mxu2 %v576_v23 }
  0xe5   :  { %v392_v22 = vadd.f32 %v391_v7, %v351_v17  ;;  %v563_v7 = vld [vmem:[%s1503_s5 + $0x8] sm:$0xff] }
  0xe6   :  { %v271_v12 = vpop.f32.mrf.mxu1  ;;  %v394_v39 = vpop.f32.mrf.mxu0 }
  0xea   :  { %v461_v19 = vpop.f32.mrf.mxu2 }
  0xee   :  { %v1398_v18 = vpop.f32.mrf.mxu1 }
  0xf2   :  { %v464_v28 = vpop.f32.mrf.mxu2 }
  0xf6   :  { %v1401_v25 = vpop.f32.mrf.mxu1 }
  0xf7   :  { %v278_v44 = vadd.f32 %v1401_v25, %v237_v38  ;;  %v568_v25 = vld [vmem:[%s1503_s5 + $0x30] sm:$0xff] }
  0xfa   :  { %v467_v42 = vpop.f32.mrf.mxu2 }
  0xfe   :  { %v420_v33 = vpop.f32.mrf.mxu1 }
  0xff   :  { %v421_v34 = vadd.f32 %v420_v33, %v380_v31  ;;  %v356_v33 = vpop.f32.mrf.mxu3 }
 0x101   :  { %v462_v40 = vadd.f32 %v461_v19, %v421_v34  ;;  %v272_v19 = vadd.f32 %v271_v12, %v231_v59  ;;  %v234_v12 = vadd.f32 %v1395_v15, %v1333_v43  ;;  %v573_v43 = vld [vmem:[%s1503_s5 + $0x58] sm:$0xff] }
 0x102   :  { %v470_v61 = vpop.f32.mrf.mxu2 }
 0x103   :  { %v485_v41 = vmax.f32 %v462_v40, 0.0  ;;  %v313_v8 = vadd.f32 %v1377_v4, %v272_v19  ;;  %v575_v4 = vld [vmem:[%s1503_s5 + $0x68] sm:$0xff] }
 0x104   :  { %584 = vmatpush.msra.mxu0 %v575_v4  ;;  %733 = vmatpush.msra.mxu2 %v575_v4 }
 0x105   :  { %529 = vmatmul.f32.vlgmr.msrb.gmra.mxu3 %v485_v41  ;;  %v354_v27 = vadd.f32 %v353_v20, %v313_v8  ;;  %v571_v41 = vld [vmem:[%s1503_s5 + $0x48] sm:$0xff] }
 0x106   :  { %v423_v49 = vpop.f32.mrf.mxu1  ;;  %585 = vmatpush.msra.mxu0 %v574_v30  ;;  %734 = vmatpush.msra.mxu2 %v574_v30 }
 0x107   :  { %v424_v51 = vadd.f32 %v423_v49, %v383_v45  ;;  %v395_v34 = vadd.f32 %v394_v39, %v354_v27  ;;  %v359_v52 = vpop.f32.mrf.mxu3 }
 0x108   :  { %586 = vmatpush.msra.mxu0 %v573_v43  ;;  %735 = vmatpush.msra.mxu2 %v573_v43  ;;  %v749_v43 = vld [vmem:[%s1504_s6] ss:$0 sm:$0xff] }
 0x109   :  { %v465_v55 = vadd.f32 %v464_v28, %v424_v51  ;;  %v275_v28 = vadd.f32 %v1398_v18, %v234_v12  ;;  %v572_v18 = vld [vmem:[%s1503_s5 + $0x50] sm:$0xff]  ;;  %v319_v51 = vadd.f32 %v1390_v13, %v278_v44  ;;  %v566_v13 = vld [vmem:[%s1503_s5 + $0x20] sm:$0xff] }
 0x10a   :  { %v473_v16 = vpop.f32.mrf.mxu2  ;;  %587 = vmatpush.msra.mxu0 %v572_v18  ;;  %736 = vmatpush.msra.mxu2 %v572_v18 }
 0x10b   :  { %v486_v56 = vmax.f32 %v465_v55, 0.0  ;;  %v316_v36 = vadd.f32 %v1385_v9, %v275_v28 }
 0x10c   :  { %588 = vmatpush.msra.mxu0 %v571_v41  ;;  %737 = vmatpush.msra.mxu2 %v571_v41 }
 0x10d   :  { %532 = vmatmul.f32.gmra.mxu3 %v486_v56  ;;  %v357_v9 = vadd.f32 %v356_v33, %v316_v36  ;;  %v360_v56 = vadd.f32 %v359_v52, %v319_v51 }
 0x10e   :  { %v426_v60 = vpop.f32.mrf.mxu1  ;;  %589 = vmatpush.msra.mxu0 %v570_v46  ;;  %738 = vmatpush.msra.mxu2 %v570_v46 }
 0x10f   :  { %v427_v63 = vadd.f32 %v426_v60, %v386_v57 }
 0x110   :  { %590 = vmatpush.msra.mxu0 %v569_v48  ;;  %739 = vmatpush.msra.mxu2 %v569_v48 }
 0x111   :  { %v468_v5 = vadd.f32 %v467_v42, %v427_v63  ;;  %v397_v42 = vpop.f32.mrf.mxu0 }
 0x112   :  { %v476_v31 = vpop.f32.mrf.mxu2  ;;  %v398_v49 = vadd.f32 %v397_v42, %v357_v9  ;;  %591 = vmatpush.msra.mxu0 %v568_v25  ;;  %740 = vmatpush.msra.mxu2 %v568_v25 }
 0x113   :  { %v487_v6 = vmax.f32 %v468_v5, 0.0 }
 0x114   :  { %592 = vmatpush.msra.mxu0 %v567_v50  ;;  %741 = vmatpush.msra.mxu2 %v567_v50 }
 0x115   :  { %535 = vmatmul.f32.gmra.mxu3 %v487_v6  ;;  %v564_v6 = vld [vmem:[%s1503_s5 + $0x10] sm:$0xff] }
 0x116   :  { %v429_v11 = vpop.f32.mrf.mxu1  ;;  %593 = vmatpush.msra.mxu0 %v566_v13  ;;  %742 = vmatpush.msra.mxu2 %v566_v13 }
 0x117   :  { %v430_v14 = vadd.f32 %v429_v11, %v389_v3  ;;  %v562_v3 = vld [vmem:[%s1503_s5] sm:$0xff] }
 0x119   :  { %v471_v35 = vadd.f32 %v470_v61, %v430_v14  ;;  %v400_v58 = vpop.f32.mrf.mxu0  ;;  %v565_v61 = vld [vmem:[%s1503_s5 + $0x18] sm:$0xff] }
 0x11a   :  { %v479_v15 = vpop.f32.mrf.mxu2  ;;  %v401_v62 = vadd.f32 %v400_v58, %v360_v56  ;;  %594 = vmatpush.msra.mxu0 %v565_v61  ;;  %743 = vmatpush.msra.mxu2 %v565_v61 }
 0x11b   :  { %v488_v21 = vmax.f32 %v471_v35, 0.0 }
 0x11c   :  { %595 = vmatpush.msra.mxu0 %v564_v6  ;;  %744 = vmatpush.msra.mxu2 %v564_v6 }
 0x11d   :  { %538 = vmatmul.f32.gmra.mxu3 %v488_v21 }
 0x11e   :  { %v432_v24 = vpop.f32.mrf.mxu1  ;;  %596 = vmatpush.msra.mxu0 %v563_v7  ;;  %745 = vmatpush.msra.mxu2 %v563_v7 }
 0x11f   :  { %v433_v26 = vadd.f32 %v432_v24, %v392_v22 }
 0x120   :  { %597 = vmatpush.msra.mxu0 %v562_v3  ;;  %746 = vmatpush.msra.mxu2 %v562_v3 }
 0x121   :  { %v474_v29 = vadd.f32 %v473_v16, %v433_v26 }
 0x122   :  { %v482_v54 = vpop.f32.mrf.mxu2 }
 0x123   :  { %v489_v32 = vmax.f32 %v474_v29, 0.0 }
 0x125   :  { %541 = vmatmul.f32.gmra.mxu3 %v489_v32 }
 0x126   :  { %v435_v37 = vpop.f32.mrf.mxu1 }
 0x127   :  { %v436_v40 = vadd.f32 %v435_v37, %v395_v34 }
 0x129   :  { %v477_v45 = vadd.f32 %v476_v31, %v436_v40 }
 0x12b   :  { %v490_v47 = vmax.f32 %v477_v45, 0.0 }
 0x12d   :  { %544 = vmatmul.f32.gmra.mxu3 %v490_v47 }
 0x12e   :  { %v438_v53 = vpop.f32.mrf.mxu1 }
 0x12f   :  { %v439_v55 = vadd.f32 %v438_v53, %v398_v49 }
 0x131   :  { %v480_v57 = vadd.f32 %v479_v15, %v439_v55 }
 0x133   :  { %v491_v60 = vmax.f32 %v480_v57, 0.0 }
 0x135   :  { %547 = vmatmul.f32.gmra.mxu3 %v491_v60 }
 0x136   :  { %v441_v63 = vpop.f32.mrf.mxu1 }
 0x137   :  { %v442_v1 = vadd.f32 %v441_v63, %v401_v62 }
 0x139   :  { %v483_v2 = vadd.f32 %v482_v54, %v442_v1 }
 0x13b   :  { %v492_v5 = vmax.f32 %v483_v2, 0.0 }
 0x13d   :  { %550 = vmatmul.f32.gmra.mxu3 %v492_v5 }
 0x188   :  { %v530_v11 = vpop.f32.mrf.mxu3 }
 0x189   :  { %v531_v59 = vadd.f32 %v748_v10, %v530_v11 }
 0x18b   :  { %v554_v14 = vmax.f32 %v531_v59, 0.0 }
 0x18d   :  { %598 = vmatmul.f32.vlgmr.msra.gmra.mxu0 %v554_v14 }
 0x190   :  { %v533_v16 = vpop.f32.mrf.mxu3 }
 0x191   :  { %v534_v17 = vadd.f32 %v748_v10, %v533_v16 }
 0x193   :  { %v555_v19 = vmax.f32 %v534_v17, 0.0 }
 0x195   :  { %601 = vmatmul.f32.gmra.mxu0 %v555_v19 }
 0x198   :  { %v536_v35 = vpop.f32.mrf.mxu3 }
 0x199   :  { %v537_v20 = vadd.f32 %v748_v10, %v536_v35 }
 0x19b   :  { %v556_v21 = vmax.f32 %v537_v20, 0.0 }
 0x19d   :  { %604 = vmatmul.f32.gmra.mxu0 %v556_v21 }
 0x1a0   :  { %v539_v22 = vpop.f32.mrf.mxu3 }
 0x1a1   :  { %v540_v8 = vadd.f32 %v748_v10, %v539_v22 }
 0x1a3   :  { %v557_v0 = vmax.f32 %v540_v8, 0.0 }
 0x1a5   :  { %607 = vmatmul.f32.gmra.mxu0 %v557_v0 }
 0x1a8   :  { %v542_v23 = vpop.f32.mrf.mxu3 }
 0x1a9   :  { %v543_v39 = vadd.f32 %v748_v10, %v542_v23 }
 0x1ab   :  { %v558_v24 = vmax.f32 %v543_v39, 0.0 }
 0x1ad   :  { %610 = vmatmul.f32.gmra.mxu0 %v558_v24 }
 0x1b0   :  { %v545_v12 = vpop.f32.mrf.mxu3 }
 0x1b1   :  { %v546_v26 = vadd.f32 %v748_v10, %v545_v12 }
 0x1b3   :  { %v559_v4 = vmax.f32 %v546_v26, 0.0 }
 0x1b5   :  { %613 = vmatmul.f32.gmra.mxu0 %v559_v4 }
 0x1b8   :  { %v548_v27 = vpop.f32.mrf.mxu3 }
 0x1b9   :  { %v549_v28 = vadd.f32 %v748_v10, %v548_v27 }
 0x1bb   :  { %v560_v29 = vmax.f32 %v549_v28, 0.0 }
 0x1bd   :  { %616 = vmatmul.f32.vlgmr.msra.gmra.mxu2 %v560_v29 }
 0x1c0   :  { %v551_v30 = vpop.f32.mrf.mxu3 }
 0x1c1   :  { %v552_v31 = vadd.f32 %v748_v10, %v551_v30 }
 0x1c3   :  { %v561_v32 = vmax.f32 %v552_v31, 0.0 }
 0x1c5   :  { %619 = vmatmul.f32.gmra.mxu2 %v561_v32 }
 0x20a   :  { %v599_v33 = vpop.f32.mrf.mxu0 }
 0x20b   :  { %v600_v34 = vadd.f32 %v749_v43, %v599_v33 }
 0x20d   :  { %623 = vmax.xlane.f32.xlu0 %v600_v34 }
 0x212   :  { %v602_v36 = vpop.f32.mrf.mxu0 }
 0x213   :  { %v603_v18 = vadd.f32 %v749_v43, %v602_v36 }
 0x215   :  { %625 = vmax.xlane.f32.xlu0 %v603_v18 }
 0x21a   :  { %v605_v37 = vpop.f32.mrf.mxu0 }
 0x21b   :  { %v606_v38 = vadd.f32 %v749_v43, %v605_v37 }
 0x21d   :  { %627 = vmax.xlane.f32.xlu1 %v606_v38 }
 0x222   :  { %v608_v40 = vpop.f32.mrf.mxu0 }
 0x223   :  { %v609_v41 = vadd.f32 %v749_v43, %v608_v40 }
 0x225   :  { %629 = vmax.xlane.f32.xlu1 %v609_v41 }
 0x22a   :  { %v611_v42 = vpop.f32.mrf.mxu0 }
 0x22b   :  { %v612_v9 = vadd.f32 %v749_v43, %v611_v42 }
 0x22d   :  { %631 = vmax.xlane.f32.xlu2 %v612_v9 }
 0x232   :  { %v614_v44 = vpop.f32.mrf.mxu0 }
 0x233   :  { %v615_v45 = vadd.f32 %v749_v43, %v614_v44 }
 0x235   :  { %633 = vmax.xlane.f32.xlu2 %v615_v45 }
 0x240   :  { %v617_v46 = vpop.f32.mrf.mxu2 }
 0x241   :  { %v618_v47 = vadd.f32 %v749_v43, %v617_v46 }
 0x243   :  { %635 = vmax.xlane.f32.xlu0 %v618_v47 }
 0x248   :  { %v620_v48 = vpop.f32.mrf.mxu2 }
 0x249   :  { %v621_v15 = vadd.f32 %v749_v43, %v620_v48 }
 0x24b   :  { %637 = vmax.xlane.f32.xlu1 %v621_v15 }
 0x280   :  { %v624_v49 = vpop.xlane.xlu0 %623 }
 0x281   :  { %v639_v51 = vsub.f32 %v600_v34, %v624_v49 }
 0x283   :  { %v647_v25 = vmul.f32 1.442695, %v639_v51 }
 0x285   :  { %750 = vpow2.f32 %v647_v25 }
 0x288   :  { %v626_v52 = vpop.xlane.xlu0 %625 }
 0x289   :  { %v640_v53 = vsub.f32 %v603_v18, %v626_v52 }
 0x28b   :  { %v751_v55 = vpop.eup %750  ;;  %v649_v50 = vmul.f32 1.442695, %v640_v53 }
 0x28c   :  { %663 = vadd.xlane.f32.xlu2 %v751_v55 }
 0x28d   :  { %752 = vpow2.f32 %v649_v50 }
 0x290   :  { %v628_v56 = vpop.xlane.xlu1 %627 }
 0x291   :  { %v641_v57 = vsub.f32 %v606_v38, %v628_v56 }
 0x293   :  { %v753_v13 = vpop.eup %752  ;;  %v651_v58 = vmul.f32 1.442695, %v641_v57 }
 0x294   :  { %665 = vadd.xlane.f32.xlu0 %v753_v13 }
 0x295   :  { %754 = vpow2.f32 %v651_v58 }
 0x298   :  { %v630_v60 = vpop.xlane.xlu1 %629 }
 0x299   :  { %v642_v61 = vsub.f32 %v609_v41, %v630_v60 }
 0x29b   :  { %v755_v62 = vpop.eup %754  ;;  %v653_v63 = vmul.f32 1.442695, %v642_v61 }
 0x29c   :  { %667 = vadd.xlane.f32.xlu1 %v755_v62 }
 0x29d   :  { %756 = vpow2.f32 %v653_v63 }
 0x2a0   :  { %v632_v54 = vpop.xlane.xlu2 %631 }
 0x2a1   :  { %v643_v1 = vsub.f32 %v612_v9, %v632_v54 }
 0x2a3   :  { %v757_v2 = vpop.eup %756  ;;  %v655_v5 = vmul.f32 1.442695, %v643_v1 }
 0x2a4   :  { %669 = vadd.xlane.f32.xlu2 %v757_v2 }
 0x2a5   :  { %758 = vpow2.f32 %v655_v5 }
 0x2a8   :  { %v634_v6 = vpop.xlane.xlu2 %633 }
 0x2a9   :  { %v644_v7 = vsub.f32 %v615_v45, %v634_v6 }
 0x2ab   :  { %v759_v3 = vpop.eup %758  ;;  %v657_v10 = vmul.f32 1.442695, %v644_v7 }
 0x2ac   :  { %671 = vadd.xlane.f32.xlu0 %v759_v3 }
 0x2ad   :  { %760 = vpow2.f32 %v657_v10 }
 0x2b3   :  { %v761_v11 = vpop.eup %760 }
 0x2b4   :  { %673 = vadd.xlane.f32.xlu1 %v761_v11 }
 0x2b6   :  { %v636_v59 = vpop.xlane.xlu0 %635 }
 0x2b7   :  { %v645_v14 = vsub.f32 %v618_v47, %v636_v59 }
 0x2b9   :  { %v659_v16 = vmul.f32 1.442695, %v645_v14 }
 0x2bb   :  { %762 = vpow2.f32 %v659_v16 }
 0x2be   :  { %v638_v17 = vpop.xlane.xlu1 %637 }
 0x2bf   :  { %v646_v19 = vsub.f32 %v621_v15, %v638_v17 }
 0x2c1   :  { %v763_v35 = vpop.eup %762  ;;  %v661_v20 = vmul.f32 1.442695, %v646_v19 }
 0x2c2   :  { %675 = vadd.xlane.f32.xlu2 %v763_v35 }
 0x2c3   :  { %764 = vpow2.f32 %v661_v20 }
 0x2c9   :  { %v765_v21 = vpop.eup %764 }
 0x2ca   :  { %677 = vadd.xlane.f32.xlu0 %v765_v21 }
 0x2ff   :  { %v664_v22 = vpop.xlane.xlu2 %663 }
 0x300   :  { %766 = vlog2.f32 %v664_v22 }
 0x306   :  { %v767_v8 = vpop.eup %766 }
 0x307   :  { %v680_v0 = vmul.f32 0.6931472, %v767_v8  ;;  %v666_v23 = vpop.xlane.xlu0 %665 }
 0x308   :  { %768 = vlog2.f32 %v666_v23 }
 0x309   :  { %v695_v39 = vsub.f32 %v639_v51, %v680_v0 }
 0x30b   :  { %703 = vst [vmem:[%s1505_s7] sm:$0xff] %v695_v39 }
 0x30e   :  { %v769_v24 = vpop.eup %768 }
 0x30f   :  { %v682_v12 = vmul.f32 0.6931472, %v769_v24  ;;  %v668_v26 = vpop.xlane.xlu1 %667 }
 0x310   :  { %770 = vlog2.f32 %v668_v26 }
 0x311   :  { %v696_v4 = vsub.f32 %v640_v53, %v682_v12 }
 0x313   :  { %704 = vst [vmem:[%s1505_s7 + $0x8] sm:$0xff] %v696_v4 }
 0x316   :  { %v771_v27 = vpop.eup %770 }
 0x317   :  { %v684_v28 = vmul.f32 0.6931472, %v771_v27  ;;  %v670_v29 = vpop.xlane.xlu2 %669 }
 0x318   :  { %772 = vlog2.f32 %v670_v29 }
 0x319   :  { %v697_v30 = vsub.f32 %v641_v57, %v684_v28 }
 0x31b   :  { %705 = vst [vmem:[%s1505_s7 + $0x10] sm:$0xff] %v697_v30 }
 0x31e   :  { %v773_v31 = vpop.eup %772 }
 0x31f   :  { %v686_v32 = vmul.f32 0.6931472, %v773_v31  ;;  %v672_v43 = vpop.xlane.xlu0 %671 }
 0x320   :  { %774 = vlog2.f32 %v672_v43 }
 0x321   :  { %v698_v33 = vsub.f32 %v642_v61, %v686_v32 }
 0x323   :  { %706 = vst [vmem:[%s1505_s7 + $0x18] sm:$0xff] %v698_v33 }
 0x326   :  { %v775_v34 = vpop.eup %774 }
 0x327   :  { %v688_v36 = vmul.f32 0.6931472, %v775_v34  ;;  %v674_v18 = vpop.xlane.xlu1 %673 }
 0x328   :  { %776 = vlog2.f32 %v674_v18 }
 0x329   :  { %v699_v37 = vsub.f32 %v643_v1, %v688_v36 }
 0x32b   :  { %707 = vst [vmem:[%s1505_s7 + $0x20] sm:$0xff] %v699_v37 }
 0x32e   :  { %v777_v38 = vpop.eup %776 }
 0x32f   :  { %v690_v40 = vmul.f32 0.6931472, %v777_v38 }
 0x331   :  { %v700_v41 = vsub.f32 %v644_v7, %v690_v40 }
 0x333   :  { %708 = vst [vmem:[%s1505_s7 + $0x28] sm:$0xff] %v700_v41 }
 0x335   :  { %v676_v42 = vpop.xlane.xlu2 %675 }
 0x336   :  { %778 = vlog2.f32 %v676_v42 }
 0x33c   :  { %v779_v9 = vpop.eup %778 }
 0x33d   :  { %v692_v44 = vmul.f32 0.6931472, %v779_v9  ;;  %v678_v45 = vpop.xlane.xlu0 %677 }
 0x33e   :  { %780 = vlog2.f32 %v678_v45 }
 0x33f   :  { %v701_v46 = vsub.f32 %v645_v14, %v692_v44 }
 0x341   :  { %709 = vst [vmem:[%s1505_s7 + $0x30] sm:$0xff] %v701_v46 }
 0x344   :  { %v781_v47 = vpop.eup %780 }
 0x345   :  { %v694_v48 = vmul.f32 0.6931472, %v781_v47 }
 0x347   :  { %v702_v15 = vsub.f32 %v646_v19, %v694_v48 }
 0x349   :  { %710 = vst [vmem:[%s1505_s7 + $0x38] sm:$0xff] %v702_v15 }

</bundles_post_ra>
